<compile_context>
chip_gen: v5e
topology: v5e:2x2
jax: 0.10.0
libtpu: 0.0.40
codegen_flags: <defaults>
</compile_context>

<pallas_src>
import math
import numpy as np
import jax
import jax.numpy as jnp
from jax.experimental import pallas as pl
from jax.experimental.pallas import tpu as pltpu

_VMEM_LIMIT_BYTES = 48 * 1024 * 1024        # scoped VMEM limit: safe on v5e/v6e (128 MiB) and v7x (64 MiB)
_VMEM_TILE_BUDGET = 40 * 1024 * 1024        # working-set budget used when picking tile sizes


def _round_up(n, m):
    return ((n + m - 1) // m) * m


def _resident_footprint(tm, d_model, d_ff, cbytes, out_bytes):
    """VMEM bytes for the weights-resident variant at row-tile size tm."""
    w = 2 * d_model * d_ff * cbytes                       # w1 + w2 (resident, single-buffered)
    io = 2 * tm * d_model * cbytes + 2 * tm * d_model * out_bytes   # double-buffered x / out tiles
    mid = tm * d_ff * 4                                   # f32 intermediate h tile
    bias = (d_ff + d_model) * 4
    return w + io + mid + bias


def _blocked_footprint(tm, tf, d_model, cbytes, out_bytes):
    """VMEM bytes for the d_ff-blocked variant at tile sizes (tm, tf)."""
    w = 2 * (d_model * tf + tf * d_model) * cbytes        # double-buffered w1/w2 k-slices
    io = 2 * tm * d_model * cbytes + 2 * tm * d_model * out_bytes
    acc = tm * d_model * 4                                # f32 accumulator scratch
    mid = tm * tf * 4                                     # f32 intermediate h tile
    bias = 2 * (tf + d_model) * 4
    return w + io + acc + mid + bias


def ffn_kernel_resident(x_ref, w1_ref, b1_ref, w2_ref, b2_ref, o_ref):
    """Both weights VMEM-resident; grid iterates over row (M) tiles only."""
    h = jnp.dot(x_ref[...], w1_ref[...], preferred_element_type=jnp.float32)
    h = jnp.maximum(h + b1_ref[...], 0.0)                 # bias + ReLU in f32
    # dropout(p) in eval mode == identity
    y = jnp.dot(h.astype(w2_ref.dtype), w2_ref[...],      # ReLU before downcast
                preferred_element_type=jnp.float32)
    o_ref[...] = (y + b2_ref[...]).astype(o_ref.dtype)


def ffn_kernel_blocked(x_ref, w1_ref, b1_ref, w2_ref, b2_ref, o_ref, acc_ref):
    """d_ff tiled as trailing reduction axis; f32 accumulator in VMEM scratch."""
    k = pl.program_id(1)

    @pl.when(k == 0)
    def _():
        acc_ref[...] = jnp.zeros_like(acc_ref)

    h = jnp.dot(x_ref[...], w1_ref[...], preferred_element_type=jnp.float32)
    h = jnp.maximum(h + b1_ref[...], 0.0)                 # per-step b1 slice + ReLU (f32)
    # dropout(p) in eval mode == identity
    acc_ref[...] += jnp.dot(h.astype(w2_ref.dtype), w2_ref[...],
                            preferred_element_type=jnp.float32)

    @pl.when(k == pl.num_programs(1) - 1)
    def _():
        # b2 added exactly once, in the finalize branch.
        o_ref[...] = (acc_ref[...] + b2_ref[...]).astype(o_ref.dtype)


def feed_forward_block(x, w1, b1, w2, b2, *,
                       compute_dtype=jnp.bfloat16,
                       tm=None, tf=2048,
                       force_blocked=False):
    """x: (batch, seq, d_model); w1: (d_model, d_ff); w2: (d_ff, d_model); biases 1-D.

    MXU inputs are cast to `compute_dtype` (bf16 by default); accumulation, bias
    adds and ReLU run in f32; output is cast back to x.dtype.
    """
    B, S, D = x.shape
    d_ff = w1.shape[1]
    M = B * S
    out_dtype = x.dtype
    cbytes = np.dtype(compute_dtype).itemsize
    obytes = np.dtype(out_dtype).itemsize

    x2d = x.reshape(M, D).astype(compute_dtype)
    w1c = w1.astype(compute_dtype)
    w2c = w2.astype(compute_dtype)
    b1f = b1.reshape(1, d_ff).astype(jnp.float32)
    b2f = b2.reshape(1, D).astype(jnp.float32)

    m8 = _round_up(M, 8)

    # --- decide kernel variant & row-tile size ("biggest tile that fits VMEM") ---
    use_resident = False
    tm_res = None
    if not force_blocked:
        candidates = [tm] if tm is not None else [1024, 512, 256, 128]
        for cand in candidates:
            cand = min(cand, m8)
            if _resident_footprint(cand, D, d_ff, cbytes, obytes) <= _VMEM_TILE_BUDGET:
                tm_res, use_resident = cand, True
                break

    cost = pl.CostEstimate(
        flops=4 * M * D * d_ff,                          # two matmuls, 2 flops / MAC
        transcendentals=0,
        bytes_accessed=(M * D + 2 * D * d_ff) * cbytes
        + (D + d_ff) * 4
        + M * D * obytes,
    )

    if use_resident:
        tm_ = tm_res
        m_pad = _round_up(M, tm_)
        if m_pad != M:
            x2d = jnp.pad(x2d, ((0, m_pad - M), (0, 0)))
        n_m = m_pad // tm_

        # ---- 1-D grid over row tiles; weights fully VMEM-resident ----
        out = pl.pallas_call(
            ffn_kernel_resident,
            out_shape=jax.ShapeDtypeStruct((m_pad, D), out_dtype),
            grid_spec=pltpu.PrefetchScalarGridSpec(
                num_scalar_prefetch=0,
                grid=(n_m,),
                in_specs=[
                    pl.BlockSpec((tm_, D),   lambda i: (i, 0)),
                    pl.BlockSpec((D, d_ff),  lambda i: (0, 0)),
                    pl.BlockSpec((1, d_ff),  lambda i: (0, 0)),
                    pl.BlockSpec((d_ff, D),  lambda i: (0, 0)),
                    pl.BlockSpec((1, D),     lambda i: (0, 0)),
                ],
                out_specs=pl.BlockSpec((tm_, D), lambda i: (i, 0)),
            ),
            compiler_params=pltpu.CompilerParams(
                dimension_semantics=("parallel",),        # megacore split on v7x
                vmem_limit_bytes=_VMEM_LIMIT_BYTES),
            cost_estimate=cost,
        )(x2d, w1c, b1f, w2c, b2f)
    else:
        # ---- 2-D grid: row tiles ("parallel") x d_ff reduction ("arbitrary", last) ----
        tf_ = max(128, (min(tf, _round_up(d_ff, 128)) // 128) * 128)
        tm_ = min(tm if tm is not None else 512, m8)
        # shrink tiles until the blocked working set fits the VMEM budget
        while (_blocked_footprint(tm_, tf_, D, cbytes, obytes) > _VMEM_TILE_BUDGET
               and (tm_ > 128 or tf_ > 128)):
            if tf_ >= tm_ and tf_ > 128:
                tf_ //= 2
            elif tm_ > 128:
                tm_ = max(128, tm_ // 2)
            else:
                break

        m_pad = _round_up(M, tm_)
        if m_pad != M:
            x2d = jnp.pad(x2d, ((0, m_pad - M), (0, 0)))
        n_m = m_pad // tm_

        ff_pad = _round_up(d_ff, tf_)
        if ff_pad != d_ff:
            w1c = jnp.pad(w1c, ((0, 0), (0, ff_pad - d_ff)))
            b1f = jnp.pad(b1f, ((0, 0), (0, ff_pad - d_ff)))
            w2c = jnp.pad(w2c, ((0, ff_pad - d_ff), (0, 0)))
        n_k = ff_pad // tf_

        out = pl.pallas_call(
            ffn_kernel_blocked,
            out_shape=jax.ShapeDtypeStruct((m_pad, D), out_dtype),
            grid_spec=pltpu.PrefetchScalarGridSpec(
                num_scalar_prefetch=0,
                grid=(n_m, n_k),
                in_specs=[
                    pl.BlockSpec((tm_, D),  lambda i, k: (i, 0)),
                    pl.BlockSpec((D, tf_),  lambda i, k: (0, k)),
                    pl.BlockSpec((1, tf_),  lambda i, k: (0, k)),
                    pl.BlockSpec((tf_, D),  lambda i, k: (k, 0)),
                    pl.BlockSpec((1, D),    lambda i, k: (0, 0)),
                ],
                out_specs=pl.BlockSpec((tm_, D), lambda i, k: (i, 0)),
                scratch_shapes=[pltpu.VMEM((tm_, D), jnp.float32)],
            ),
            compiler_params=pltpu.CompilerParams(
                dimension_semantics=("parallel", "arbitrary"),
                vmem_limit_bytes=_VMEM_LIMIT_BYTES),
            cost_estimate=cost,
        )(x2d, w1c, b1f, w2c, b2f)

    return out[:M].reshape(B, S, D)


def init_params(key, d_model, d_ff, dtype=jnp.float32):
    """Deterministic init mimicking nn.Linear's default U(-1/sqrt(fan_in), 1/sqrt(fan_in))."""
    k1, k2, k3, k4 = jax.random.split(key, 4)
    bound1 = 1.0 / math.sqrt(d_model)
    bound2 = 1.0 / math.sqrt(d_ff)
    # stored transposed relative to PyTorch: (in_features, out_features)
    w1 = jax.random.uniform(k1, (d_model, d_ff), dtype, -bound1, bound1)
    b1 = jax.random.uniform(k2, (d_ff,), dtype, -bound1, bound1)
    w2 = jax.random.uniform(k3, (d_ff, d_model), dtype, -bound2, bound2)
    b2 = jax.random.uniform(k4, (d_model,), dtype, -bound2, bound2)
    return w1, b1, w2, b2


def reference(x, w1, b1, w2, b2, compute_dtype):
    """Pure-JAX reference matching the kernel's dtype strategy."""
    f32 = jnp.float32
    xc = x.astype(compute_dtype).astype(f32)
    w1c = w1.astype(compute_dtype).astype(f32)
    w2c = w2.astype(compute_dtype).astype(f32)
    h = jnp.maximum(jnp.einsum("bsd,df->bsf", xc, w1c) + b1.astype(f32), 0.0)
    h = h.astype(compute_dtype).astype(f32)
    y = jnp.einsum("bsf,fd->bsd", h, w2c) + b2.astype(f32)
    return y.astype(x.dtype)


if __name__ == "__main__":
    key = jax.random.PRNGKey(0)
    kx, kp = jax.random.split(key)

    # --- Test 1: f32 compute path, weights-resident kernel (tight check) ---
    batch, seq, d_model, d_ff = 2, 8, 32, 64
    x = jax.random.normal(kx, (batch, seq, d_model), jnp.float32)
    w1, b1, w2, b2 = init_params(kp, d_model, d_ff)

    out_f32 = jax.block_until_ready(
        feed_forward_block(x, w1, b1, w2, b2, compute_dtype=jnp.float32))
    ref_f32 = reference(x, w1, b1, w2, b2, jnp.float32)
    assert out_f32.shape == (batch, seq, d_model)
    assert jnp.allclose(out_f32, ref_f32, atol=1e-4, rtol=1e-4), "f32 resident mismatch"

    # --- Test 2: bf16 MXU inputs (fast path), weights-resident kernel ---
    out_bf16 = jax.block_until_ready(
        feed_forward_block(x, w1, b1, w2, b2, compute_dtype=jnp.bfloat16))
    ref_bf16 = reference(x, w1, b1, w2, b2, jnp.bfloat16)
    assert jnp.allclose(out_bf16, ref_bf16, atol=1e-2, rtol=1e-2), "bf16 resident mismatch"

    # --- Test 3: forced d_ff-blocked accumulator path (2 reduction steps) ---
    d_model2, d_ff2 = 128, 256
    kx2, kp2 = jax.random.split(kp)
    x2 = jax.random.normal(kx2, (batch, seq, d_model2), jnp.float32)
    p2 = init_params(kp2, d_model2, d_ff2)
    out_blk = jax.block_until_ready(
        feed_forward_block(x2, *p2, compute_dtype=jnp.bfloat16, tf=128, force_blocked=True))
    ref_blk = reference(x2, *p2, jnp.bfloat16)
    assert out_blk.shape == (batch, seq, d_model2)
    assert jnp.allclose(out_blk, ref_blk, atol=1e-2, rtol=1e-2), "bf16 blocked mismatch"

    print("KERNEL_OK")
</pallas_src>

<mosaic_0001>
module attributes {stable_mosaic.version = 11 : i64} {
  func.func @ffn_kernel_resident(%arg0: i32, %arg1: memref<16x32xf32, #tpu.memory_space<vmem>>, %arg2: memref<32x64xf32, #tpu.memory_space<vmem>>, %arg3: memref<1x64xf32, #tpu.memory_space<vmem>>, %arg4: memref<64x32xf32, #tpu.memory_space<vmem>>, %arg5: memref<1x32xf32, #tpu.memory_space<vmem>>, %arg6: memref<16x32xf32, #tpu.memory_space<vmem>>) attributes {dimension_semantics = [#tpu.dimension_semantics<parallel>], iteration_bounds = array<i64: 1>, scalar_prefetch = 0 : i64, scratch_operands = 0 : i64, tpu.core_type = #tpu.core_type<tc>, window_params = [{transform_indices = @transform_0, window_bounds = array<i64: 16, 32>}, {pipeline_mode = #tpu.pipeline_mode<synchronous>, transform_indices = @transform_1, window_bounds = array<i64: 32, 64>}, {pipeline_mode = #tpu.pipeline_mode<synchronous>, transform_indices = @transform_2, window_bounds = array<i64: 1, 64>}, {pipeline_mode = #tpu.pipeline_mode<synchronous>, transform_indices = @transform_3, window_bounds = array<i64: 64, 32>}, {pipeline_mode = #tpu.pipeline_mode<synchronous>, transform_indices = @transform_4, window_bounds = array<i64: 1, 32>}, {transform_indices = @transform_5, window_bounds = array<i64: 16, 32>}]} {
    %c0 = arith.constant 0 : index
    %c0_0 = arith.constant 0 : index
    %0 = vector.load %arg1[%c0, %c0_0] : memref<16x32xf32, #tpu.memory_space<vmem>>, vector<16x32xf32>
    %c0_1 = arith.constant 0 : index
    %c0_2 = arith.constant 0 : index
    %1 = vector.load %arg2[%c0_1, %c0_2] : memref<32x64xf32, #tpu.memory_space<vmem>>, vector<32x64xf32>
    %cst = arith.constant dense<0.000000e+00> : vector<16x64xf32>
    %2 = tpu.matmul %0, %1, %cst {dimension_numbers = #tpu.dot_dimension_numbers<[1], [0], [0], [1], [0, 0, 1, 1], [], []>} : vector<16x32xf32>, vector<32x64xf32>, vector<16x64xf32> -> vector<16x64xf32>
    %c0_3 = arith.constant 0 : index
    %c0_4 = arith.constant 0 : index
    %3 = vector.load %arg3[%c0_3, %c0_4] : memref<1x64xf32, #tpu.memory_space<vmem>>, vector<1x64xf32>
    %4 = vector.broadcast %3 : vector<1x64xf32> to vector<16x64xf32>
    %5 = arith.addf %2, %4 : vector<16x64xf32>
    %cst_5 = arith.constant 0.000000e+00 : f32
    %6 = vector.broadcast %cst_5 : f32 to vector<16x64xf32>
    %7 = arith.maximumf %5, %6 : vector<16x64xf32>
    %c0_6 = arith.constant 0 : index
    %c0_7 = arith.constant 0 : index
    %8 = vector.load %arg4[%c0_6, %c0_7] : memref<64x32xf32, #tpu.memory_space<vmem>>, vector<64x32xf32>
    %cst_8 = arith.constant dense<0.000000e+00> : vector<16x32xf32>
    %9 = tpu.matmul %7, %8, %cst_8 {dimension_numbers = #tpu.dot_dimension_numbers<[1], [0], [0], [1], [0, 0, 1, 1], [], []>} : vector<16x64xf32>, vector<64x32xf32>, vector<16x32xf32> -> vector<16x32xf32>
    %c0_9 = arith.constant 0 : index
    %c0_10 = arith.constant 0 : index
    %10 = vector.load %arg5[%c0_9, %c0_10] : memref<1x32xf32, #tpu.memory_space<vmem>>, vector<1x32xf32>
    %11 = vector.broadcast %10 : vector<1x32xf32> to vector<16x32xf32>
    %12 = arith.addf %9, %11 : vector<16x32xf32>
    %c0_11 = arith.constant 0 : index
    %c0_12 = arith.constant 0 : index
    %13 = vector.load %arg6[%c0_11, %c0_12] : memref<16x32xf32, #tpu.memory_space<vmem>>, vector<16x32xf32>
    tpu.vector_store %arg6[%c0_11, %c0_12], %12 {strides = array<i32>} : memref<16x32xf32, #tpu.memory_space<vmem>>, vector<16x32xf32>,
    return
  }
  func.func @transform_0(%arg0: i32) -> (i32, i32) {
    %c0_i32 = arith.constant 0 : i32
    %c0_i32_0 = arith.constant 0 : i32
    return %arg0, %c0_i32 : i32, i32
  }
  func.func @transform_1(%arg0: i32) -> (i32, i32) {
    %c0_i32 = arith.constant 0 : i32
    %c0_i32_0 = arith.constant 0 : i32
    %c0_i32_1 = arith.constant 0 : i32
    return %c0_i32, %c0_i32_0 : i32, i32
  }
  func.func @transform_2(%arg0: i32) -> (i32, i32) {
    %c0_i32 = arith.constant 0 : i32
    %c0_i32_0 = arith.constant 0 : i32
    %c0_i32_1 = arith.constant 0 : i32
    return %c0_i32, %c0_i32_0 : i32, i32
  }
  func.func @transform_3(%arg0: i32) -> (i32, i32) {
    %c0_i32 = arith.constant 0 : i32
    %c0_i32_0 = arith.constant 0 : i32
    %c0_i32_1 = arith.constant 0 : i32
    return %c0_i32, %c0_i32_0 : i32, i32
  }
  func.func @transform_4(%arg0: i32) -> (i32, i32) {
    %c0_i32 = arith.constant 0 : i32
    %c0_i32_0 = arith.constant 0 : i32
    %c0_i32_1 = arith.constant 0 : i32
    return %c0_i32, %c0_i32_0 : i32, i32
  }
  func.func @transform_5(%arg0: i32) -> (i32, i32) {
    %c0_i32 = arith.constant 0 : i32
    %c0_i32_0 = arith.constant 0 : i32
    return %arg0, %c0_i32 : i32, i32
  }
}

</mosaic_0001>

<bundles_post_ra>
// kernel: tpu_custom_call.1
= control target key start
LH: loop header
LB: loop body
LE: loop exit
PB: predicated region body
PF: predicated region fallthrough
CT: control target
= control target key end

     0   :  { %s260_s0 = inlined_call_operand.vmem [shape: f32[16,32], index: 0, kind: input, shape index: {}]   ;;  %s261_s1 = inlined_call_operand.vmem [shape: f32[32,64], index: 1, kind: input, shape index: {}]   ;;  %s262_s2 = inlined_call_operand.vmem [shape: f32[1,64], index: 2, kind: input, shape index: {}]   ;;  %s263_s3 = inlined_call_operand.vmem [shape: f32[64,32], index: 3, kind: input, shape index: {}]   ;;  %s264_s4 = inlined_call_operand.vmem [shape: f32[1,32], index: 4, kind: input, shape index: {}]   ;;  %s265_s5 = inlined_call_operand.hbm [shape: f32[16,32], index: 5, kind: output, shape index: {}]  }
   0x1   :  { %v26_v0 = vld [vmem:[%s261_s1 + $0x18] sm:$0xff]  ;;  %v25_v1 = vld [vmem:[%s261_s1 + $0x10] sm:$0xff]  ;;  %v24_v2 = vld [vmem:[%s261_s1 + $0x8] sm:$0xff] }
   0x2   :  { %129 = vmatpush.msra.mxu3 %v26_v0  ;;  %50 = vmatpush.msra.mxu0 %v26_v0  ;;  %v70_v3 = vld [vmem:[%s263_s3 + $0x38] sm:$0xff]  ;;  %v69_v4 = vld [vmem:[%s263_s3 + $0x30] sm:$0xff]  ;;  %v23_v5 = vld [vmem:[%s261_s1] sm:$0xff] }
   0x3   :  { %133 = vmatpush.msra.mxu2 %v70_v3  ;;  %90 = vmatpush.msra.mxu1 %v70_v3 }
   0x4   :  { %130 = vmatpush.msra.mxu3 %v25_v1  ;;  %51 = vmatpush.msra.mxu0 %v25_v1 }
   0x5   :  { %10 = vsyncpa [#allocation3], 0  ;;  %v22_v6 = vld [vmem:[%s260_s0 + $0x8] sm:$0xff]  ;;  %vm31_vm0 = vcmask 261120   ;;  %v21_v7 = vld [vmem:[%s260_s0] sm:$0xff]  ;;  %134 = vmatpush.msra.mxu2 %v69_v4  ;;  %91 = vmatpush.msra.mxu1 %v69_v4  ;;  %vm75_vm1 = vcmask 523264  }
   0x6   :  { %131 = vmatpush.msra.mxu3 %v24_v2  ;;  %52 = vmatpush.msra.mxu0 %v24_v2  ;;  %v68_v8 = vld [vmem:[%s263_s3 + $0x28] sm:$0xff]  ;;  %v67_v9 = vld [vmem:[%s263_s3 + $0x20] sm:$0xff]  ;;  %v66_v10 = vld [vmem:[%s263_s3 + $0x18] sm:$0xff]  ;;  %s113_s25 = sshll.u32 %s265_s5, 4  ;;  %s173_s26 = smov 128   ;;  %s114_s25 = int_to_ptr.hbm [resolvable:$true] %s113_s25 }
   0x7   :  { %135 = vmatpush.msra.mxu2 %v68_v8  ;;  %92 = vmatpush.msra.mxu1 %v68_v8  ;;  %v65_v11 = vld [vmem:[%s263_s3 + $0x10] sm:$0xff]  ;;  %v64_v12 = vld [vmem:[%s263_s3 + $0x8] sm:$0xff]  ;;  %v63_v13 = vld [vmem:[%s263_s3] sm:$0xff]  ;;  %s172_s3 = smov [#allocation2]   ;;  %s174_s27 = smov 8  }
   0x8   :  { %132 = vmatpush.msra.mxu3 %v23_v5  ;;  %53 = vmatpush.msra.mxu0 %v23_v5  ;;  %v144_v14 = vld [vmem:[%s262_s2] ss:$0 sm:$0xff]  ;;  %s111_s23 = sshll.u32 %s172_s3, 4  ;;  %s112_s23 = int_to_ptr.vmem [resolvable:$true] %s111_s23 }
   0x9   :  { %126 = vmatmul.msk.f32.vlgmr.msra.gmra.mxu3 %vm31_vm0, %v22_v6  ;;  %125 = vmatmul.msk.f32.vlgmr.msra.gmra.mxu0 %vm31_vm0, %v21_v7  ;;  %v145_v21 = vld [vmem:[%s264_s4] ss:$0 sm:$0xff] }
   0xa   :  { %136 = vmatpush.msra.mxu2 %v67_v9  ;;  %93 = vmatpush.msra.mxu1 %v67_v9 }
   0xc   :  { %137 = vmatpush.msra.mxu2 %v66_v10  ;;  %94 = vmatpush.msra.mxu1 %v66_v10 }
   0xe   :  { %138 = vmatpush.msra.mxu2 %v65_v11  ;;  %95 = vmatpush.msra.mxu1 %v65_v11 }
  0x10   :  { %139 = vmatpush.msra.mxu2 %v64_v12  ;;  %96 = vmatpush.msra.mxu1 %v64_v12 }
  0x12   :  { %140 = vmatpush.msra.mxu2 %v63_v13  ;;  %97 = vmatpush.msra.mxu1 %v63_v13 }
  0x86   :  { %v55_v15 = vpop.f32.mrf.mxu0 }
  0x87   :  { %v56_v16 = vadd.f32 %v144_v14, %v55_v15 }
  0x89   :  { %v61_v17 = vmax.f32 %v56_v16, 0.0 }
  0x8b   :  { %127 = vmatmul.msk.f32.vlgmr.msra.gmra.mxu1 %vm75_vm1, %v61_v17 }
  0x8c   :  { %v58_v18 = vpop.f32.mrf.mxu3 }
  0x8d   :  { %v59_v19 = vadd.f32 %v144_v14, %v58_v18 }
  0x8f   :  { %v62_v20 = vmax.f32 %v59_v19, 0.0 }
  0x91   :  { %128 = vmatmul.msk.f32.vlgmr.msra.gmra.mxu2 %vm75_vm1, %v62_v20 }
 0x108   :  { %v99_v22 = vpop.f32.mrf.mxu1 }
 0x109   :  { %v100_v23 = vadd.f32 %v145_v21, %v99_v22 }
 0x10b   :  { %105 = vst.msk [vmem:[#allocation2] sm:$0xff] %vm31_vm0, %v100_v23 }
 0x114   :  { %v102_v24 = vpop.f32.mrf.mxu2 }
 0x115   :  { %v103_v25 = vadd.f32 %v145_v21, %v102_v24 }
 0x117   :  { %106 = vst.msk [vmem:[#allocation2 + $0x8] sm:$0xff] %vm31_vm0, %v103_v25 }
 0x118   :  { %119 = dma.vmem_to_hbm [thread:$0]  %s112_s23, 256, %s114_s25, [#allocation3], %s173_s26, %s173_s26, %s174_s27  }
 0x119   :  { %170 = dma.done.wait [#allocation3], 256  }
 0x11a   :  { %171 = vsyncadd [#allocation3], 4294967040 }
 0x11b   :  { %124 = vsyncpa [#allocation3], 1 }

</bundles_post_ra>
